<compile_context>
chip_gen: v7x
topology: tpu7x:2x2x1
jax: 0.10.0
libtpu: 0.0.40
codegen_flags: <defaults>
</compile_context>

<pallas_src>
import jax
import jax.numpy as jnp
from jax.experimental import pallas as pl
from jax.experimental.pallas import tpu as pltpu


def _round_up(x, m):
    return (x + m - 1) // m * m


def lora_kernel(x_ref, wd_t_ref, wu_t_ref, o_ref):
    # x_ref:    (tm, in_p)    bf16 tile of flattened tokens
    # wd_t_ref: (in_p, r_p)   bf16 down-projection (transposed, rank padded to 128)
    # wu_t_ref: (r_p, out_p)  bf16 up-projection (transposed, rank padded to 128)
    # o_ref:    (tm, out_p)
    down = jnp.dot(x_ref[...], wd_t_ref[...], preferred_element_type=jnp.float32)
    down = down.astype(wu_t_ref.dtype)  # feed MXU in bf16; accumulate in f32
    out = jnp.dot(down, wu_t_ref[...], preferred_element_type=jnp.float32)
    o_ref[...] = out.astype(o_ref.dtype)


def lora_forward(x, wd, wu, *, tm=256, compute_dtype=jnp.bfloat16):
    """x: (..., in_features); wd: (rank, in_features); wu: (out_features, rank)."""
    in_features = x.shape[-1]
    rank = wd.shape[0]
    out_features = wu.shape[0]
    lead_shape = x.shape[:-1]
    out_dtype = x.dtype

    x2d = x.reshape(-1, in_features)
    M = x2d.shape[0]

    # Lane-align all feature dims (128) so loads/stores are lane-dense and the
    # MXU contraction granule is fully fed.
    in_p = _round_up(in_features, 128)
    out_p = _round_up(out_features, 128)
    r_p = _round_up(rank, 128)

    # Token-tile selection: big tiles, but never larger than the (sublane
    # padded) token count, and keep >= 2 grid steps when possible so v7x's
    # two TensorCores both get work.
    tm = min(tm, _round_up(M, 8))
    while tm > 128 and pl.cdiv(M, tm) < 2:
        tm //= 2
    M_p = _round_up(M, tm)
    grid_m = M_p // tm

    # Zero-padded, bf16 operands (exactly numerically neutral padding).
    x_p = (
        jnp.zeros((M_p, in_p), compute_dtype)
        .at[:M, :in_features]
        .set(x2d.astype(compute_dtype))
    )
    wd_t = (
        jnp.zeros((in_p, r_p), compute_dtype)
        .at[:in_features, :rank]
        .set(wd.T.astype(compute_dtype))
    )
    wu_t = (
        jnp.zeros((r_p, out_p), compute_dtype)
        .at[:rank, :out_features]
        .set(wu.T.astype(compute_dtype))
    )

    itemsize = jnp.dtype(compute_dtype).itemsize
    cost = pl.CostEstimate(
        flops=2 * M_p * (in_p * r_p + r_p * out_p),
        transcendentals=0,
        bytes_accessed=(
            (M_p * in_p + in_p * r_p + r_p * out_p) * itemsize
            + M_p * out_p * jnp.dtype(out_dtype).itemsize
        ),
    )

    out = pl.pallas_call(
        lora_kernel,
        out_shape=jax.ShapeDtypeStruct((M_p, out_p), out_dtype),
        grid_spec=pltpu.PrefetchScalarGridSpec(
            num_scalar_prefetch=0,
            grid=(grid_m,),
            in_specs=[
                pl.BlockSpec((tm, in_p), lambda i: (i, 0)),
                # Weight blocks are constant across the grid (index_map -> (0,0));
                # they are tiny for LoRA so default double-buffering is negligible.
                pl.BlockSpec((in_p, r_p), lambda i: (0, 0)),
                pl.BlockSpec((r_p, out_p), lambda i: (0, 0)),
            ],
            out_specs=pl.BlockSpec((tm, out_p), lambda i: (i, 0)),
        ),
        compiler_params=pltpu.CompilerParams(
            dimension_semantics=("parallel",),
            vmem_limit_bytes=64 * 1024 * 1024,
        ),
        cost_estimate=cost,
    )(x_p, wd_t, wu_t)

    out = out[:M, :out_features]
    return out.reshape(*lead_shape, out_features)


if __name__ == "__main__":
    key = jax.random.PRNGKey(0)
    kx, kd, ku, kx2 = jax.random.split(key, 4)

    # --- case 1: small shapes matching the module spec ---
    batch, seq = 2, 8
    in_features, out_features, rank = 32, 32, 4

    x = jax.random.normal(kx, (batch, seq, in_features), dtype=jnp.float32)
    # Deterministic synthetic weights (PyTorch Linear weight shapes).
    wd = jax.random.normal(kd, (rank, in_features), dtype=jnp.float32) * 0.1
    wu = jax.random.normal(ku, (out_features, rank), dtype=jnp.float32) * 0.1

    y = lora_forward(x, wd, wu)
    jax.block_until_ready(y)

    y_ref = (x @ wd.T) @ wu.T
    assert y.shape == (batch, seq, out_features)
    # bf16 inputs with f32 accumulation -> ~1e-3 abs error at these magnitudes.
    assert jnp.allclose(y, y_ref, atol=2e-2, rtol=2e-2), float(
        jnp.max(jnp.abs(y - y_ref))
    )

    # --- case 2: ragged token count (exercises M padding path) ---
    x2 = jax.random.normal(kx2, (3, 5, in_features), dtype=jnp.float32)
    y2 = lora_forward(x2, wd, wu)
    jax.block_until_ready(y2)
    y2_ref = (x2 @ wd.T) @ wu.T
    assert y2.shape == (3, 5, out_features)
    assert jnp.allclose(y2, y2_ref, atol=2e-2, rtol=2e-2), float(
        jnp.max(jnp.abs(y2 - y2_ref))
    )

    print("KERNEL_OK")
</pallas_src>

<mosaic_0001>
module attributes {stable_mosaic.version = 11 : i64} {
  func.func @lora_kernel(%arg0: i32, %arg1: memref<16x128xbf16, #tpu.memory_space<vmem>>, %arg2: memref<128x128xbf16, #tpu.memory_space<vmem>>, %arg3: memref<128x128xbf16, #tpu.memory_space<vmem>>, %arg4: memref<16x128xf32, #tpu.memory_space<vmem>>) attributes {dimension_semantics = [#tpu.dimension_semantics<parallel>], iteration_bounds = array<i64: 1>, scalar_prefetch = 0 : i64, scratch_operands = 0 : i64, tpu.core_type = #tpu.core_type<tc>, window_params = [{transform_indices = @transform_0, window_bounds = array<i64: 16, 128>}, {pipeline_mode = #tpu.pipeline_mode<synchronous>, transform_indices = @transform_1, window_bounds = array<i64: 128, 128>}, {pipeline_mode = #tpu.pipeline_mode<synchronous>, transform_indices = @transform_2, window_bounds = array<i64: 128, 128>}, {transform_indices = @transform_3, window_bounds = array<i64: 16, 128>}]} {
    %c0 = arith.constant 0 : index
    %c0_0 = arith.constant 0 : index
    %0 = vector.load %arg1[%c0, %c0_0] : memref<16x128xbf16, #tpu.memory_space<vmem>>, vector<16x128xbf16>
    %c0_1 = arith.constant 0 : index
    %c0_2 = arith.constant 0 : index
    %1 = vector.load %arg2[%c0_1, %c0_2] : memref<128x128xbf16, #tpu.memory_space<vmem>>, vector<128x128xbf16>
    %cst = arith.constant dense<0.000000e+00> : vector<16x128xf32>
    %2 = tpu.matmul %0, %1, %cst {dimension_numbers = #tpu.dot_dimension_numbers<[1], [0], [0], [1], [0, 0, 1, 1], [], []>} : vector<16x128xbf16>, vector<128x128xbf16>, vector<16x128xf32> -> vector<16x128xf32>
    %3 = arith.truncf %2 : vector<16x128xf32> to vector<16x128xbf16>
    %c0_3 = arith.constant 0 : index
    %c0_4 = arith.constant 0 : index
    %4 = vector.load %arg3[%c0_3, %c0_4] : memref<128x128xbf16, #tpu.memory_space<vmem>>, vector<128x128xbf16>
    %cst_5 = arith.constant dense<0.000000e+00> : vector<16x128xf32>
    %5 = tpu.matmul %3, %4, %cst_5 {dimension_numbers = #tpu.dot_dimension_numbers<[1], [0], [0], [1], [0, 0, 1, 1], [], []>} : vector<16x128xbf16>, vector<128x128xbf16>, vector<16x128xf32> -> vector<16x128xf32>
    %c0_6 = arith.constant 0 : index
    %c0_7 = arith.constant 0 : index
    %6 = vector.load %arg4[%c0_6, %c0_7] : memref<16x128xf32, #tpu.memory_space<vmem>>, vector<16x128xf32>
    tpu.vector_store %arg4[%c0_6, %c0_7], %5 {strides = array<i32>} : memref<16x128xf32, #tpu.memory_space<vmem>>, vector<16x128xf32>,
    return
  }
  func.func @transform_0(%arg0: i32) -> (i32, i32) {
    %c0_i32 = arith.constant 0 : i32
    %c0_i32_0 = arith.constant 0 : i32
    return %arg0, %c0_i32 : i32, i32
  }
  func.func @transform_1(%arg0: i32) -> (i32, i32) {
    %c0_i32 = arith.constant 0 : i32
    %c0_i32_0 = arith.constant 0 : i32
    %c0_i32_1 = arith.constant 0 : i32
    return %c0_i32, %c0_i32_0 : i32, i32
  }
  func.func @transform_2(%arg0: i32) -> (i32, i32) {
    %c0_i32 = arith.constant 0 : i32
    %c0_i32_0 = arith.constant 0 : i32
    %c0_i32_1 = arith.constant 0 : i32
    return %c0_i32, %c0_i32_0 : i32, i32
  }
  func.func @transform_3(%arg0: i32) -> (i32, i32) {
    %c0_i32 = arith.constant 0 : i32
    %c0_i32_0 = arith.constant 0 : i32
    return %arg0, %c0_i32 : i32, i32
  }
}

</mosaic_0001>

<bundles_post_ra>
// kernel: tpu_custom_call.1
= control target key start
LH: loop header
LB: loop body
LE: loop exit
PB: predicated region body
PF: predicated region fallthrough
CT: control target
= control target key end

     0   :  { %8 = vsyncpa [#allocation3], 0  ;;  %s586_s0 = inlined_call_operand.hbm [shape: bf16[16,128], index: 0, kind: input, shape index: {}]   ;;  %s587_s1 = inlined_call_operand.hbm [shape: bf16[128,128], index: 1, kind: input, shape index: {}]   ;;  %s588_s2 = inlined_call_operand.hbm [shape: bf16[128,128], index: 2, kind: input, shape index: {}]   ;;  %s589_s3 = inlined_call_operand.hbm [shape: f32[16,128], index: 3, kind: output, shape index: {}]  }
   0x1   :  { %9 = vsyncpa [#allocation6], 0 }
   0x2   :  { %10 = vsyncpa [#allocation4], 0  ;;  %s492_s12 = smov [#allocation5]   ;;  %s493_s14 = smov [#allocation2]  }
   0x3   :  { %s28_s13 = sshll.u32 %s492_s12, 4  ;;  %s16_s15 = sshll.u32 %s493_s14, 4  ;;  %s29_s13 = int_to_ptr.vmem [resolvable:$true] %s28_s13  ;;  %s522_s15 = int_to_ptr.vmem [resolvable:$true] %s16_s15 }
   0x4   :  { %s398_s18 = scalar_lea.hbm %s587_s1, 1024 }
   0x5   :  { %p399_p0 = scmp.ne.s32.totalorder %s587_s1, %s398_s18  ;;  %p402_p1 = scmp.lt.u32.totalorder %s398_s18, %s587_s1 }
   0x7   :  { %p404_p2 = pnand %p402_p1, %p399_p0 }
   0x9   :  { %407 = shalt.err (!%p404_p2)
}
   0xa   :  { %s408_s23 = scalar_lea.vmem %s29_s13, 1024  ;;  %p413_p4 = scmp.lt.s32.totalorder %s29_s13, %s29_s13 }
   0xb   :  { %p409_p3 = scmp.ne.s32.totalorder %s29_s13, %s408_s23  ;;  %p414_p5 = scmp.lt.s32.totalorder %s408_s23, %s408_s23 }
   0xd   :  { %p415_p6 = por %p414_p5, %p413_p4 }
   0xf   :  { %p416_p7 = pnand %p415_p6, %p409_p3 }
  0x11   :  { %419 = shalt.err (!%p416_p7)
}
  0x12   :  { %s494_s24 = smov 64   ;;  %s495_s25 = smov 4  }
  0x13   :  { %34 = dma.hbm_to_vmem [thread:$0]  %s587_s1, 1024, %s29_s13, [#allocation6], %s494_s24, %s494_s24, %s495_s25  }
  0x14   :  { %s420_s30 = scalar_lea.hbm %s586_s0, 128 }
  0x15   :  { %p421_p8 = scmp.ne.s32.totalorder %s586_s0, %s420_s30  ;;  %p424_p9 = scmp.lt.u32.totalorder %s420_s30, %s586_s0 }
  0x17   :  { %p426_p10 = pnand %p424_p9, %p421_p8 }
  0x19   :  { %429 = shalt.err (!%p426_p10)
}
  0x1a   :  { %s430_s8 = scalar_lea.vmem %s522_s15, 128  ;;  %p435_p12 = scmp.lt.s32.totalorder %s522_s15, %s522_s15 }
  0x1b   :  { %p431_p11 = scmp.ne.s32.totalorder %s522_s15, %s430_s8  ;;  %p436_p13 = scmp.lt.s32.totalorder %s430_s8, %s430_s8 }
  0x1d   :  { %p437_p0 = por %p436_p13, %p435_p12 }
  0x1f   :  { %p438_p1 = pnand %p437_p0, %p431_p11 }
  0x21   :  { %441 = shalt.err (!%p438_p1)
}
  0x22   :  { %22 = dma.hbm_to_vmem [thread:$0]  %s586_s0, 128, %s522_s15, [#allocation3], %s494_s24, %s494_s24, %s495_s25  }
  0x23   :  { %s496_s10 = smov [#allocation7]   ;;  %s442_s14 = scalar_lea.hbm %s588_s2, 1024 }
  0x24   :  { %s40_s11 = sshll.u32 %s496_s10, 4  ;;  %p443_p2 = scmp.ne.s32.totalorder %s588_s2, %s442_s14  ;;  %s41_s11 = int_to_ptr.vmem [resolvable:$true] %s40_s11 }
  0x25   :  { %p446_p3 = scmp.lt.u32.totalorder %s442_s14, %s588_s2 }
  0x27   :  { %p448_p4 = pnand %p446_p3, %p443_p2 }
  0x29   :  { %451 = shalt.err (!%p448_p4)
}
  0x2a   :  { %s452_s20 = scalar_lea.vmem %s41_s11, 1024  ;;  %p457_p6 = scmp.lt.s32.totalorder %s41_s11, %s41_s11 }
  0x2b   :  { %p453_p5 = scmp.ne.s32.totalorder %s41_s11, %s452_s20  ;;  %p458_p7 = scmp.lt.s32.totalorder %s452_s20, %s452_s20 }
  0x2d   :  { %p459_p8 = por %p458_p7, %p457_p6 }
  0x2f   :  { %p460_p9 = pnand %p459_p8, %p453_p5 }
  0x31   :  { %463 = shalt.err (!%p460_p9)
}
  0x32   :  { %46 = dma.hbm_to_vmem [thread:$0]  %s588_s2, 1024, %s41_s11, [#allocation6], %s494_s24, %s494_s24, %s495_s25  }
  0x33   :  { %486 = dma.done.wait [#allocation3], 128  }
  0x34   :  { %487 = vsyncadd [#allocation3], 4294967168 }
  0x35   :  { %488 = dma.done.wait [#allocation6], 2048  }
  0x36   :  { %489 = vsyncadd [#allocation6], 4294965248  ;;  %v497_v0 = vmov 0.0   ;;  %vm498_vm0 = vmmov 0   ;;  %v381_v1 = vld [vmem:[#allocation5] sm:$0xff]   ;;  %v382_v2 = vld [vmem:[#allocation5 + $0x8] sm:$0xff]  }
  0x37   :  { %331 = vmatprep.subr.bf16.mxu0 %v497_v0  ;;  %347 = vmatprep.mubr.msk.bf16.mxu0 %vm498_vm0, %v497_v0  ;;  %v383_v3 = vld [vmem:[#allocation5 + $0x10] sm:$0xff]   ;;  %v390_v4 = vld [vmem:[#allocation7] sm:$0xff]   ;;  %v384_v5 = vld [vmem:[#allocation5 + $0x18] sm:$0xff]   ;;  %s499_s2 = smov [#allocation8]  }
  0x38   :  { %351 = vmatprep.subr.bf16.mxu1 %v497_v0  ;;  %367 = vmatprep.mubr.msk.bf16.mxu1 %vm498_vm0, %v497_v0  ;;  %v391_v6 = vld [vmem:[#allocation7 + $0x8] sm:$0xff]   ;;  %v385_v7 = vld [vmem:[#allocation5 + $0x20] sm:$0xff]   ;;  %v392_v8 = vld [vmem:[#allocation7 + $0x10] sm:$0xff]   ;;  %s283_s21 = sshll.u32 %s499_s2, 4  ;;  %s284_s21 = int_to_ptr.vmem [resolvable:$true] %s283_s21 }
  0x39   :  { %332 = vmatpush3.bf16.msra.mxu0 %v381_v1  ;;  %352 = vmatpush3.bf16.msra.mxu1 %v390_v4  ;;  %v386_v9 = vld [vmem:[#allocation5 + $0x28] sm:$0xff]   ;;  %v393_v10 = vld [vmem:[#allocation7 + $0x18] sm:$0xff]   ;;  %v387_v11 = vld [vmem:[#allocation5 + $0x30] sm:$0xff]   ;;  %s464_s22 = scalar_lea.vmem %s284_s21, 256  ;;  %p469_p11 = scmp.lt.s32.totalorder %s284_s21, %s284_s21 }
  0x3a   :  { %333 = vmatprep.subr.bf16.mxu0 %v497_v0  ;;  %353 = vmatprep.subr.bf16.mxu1 %v497_v0  ;;  %v394_v12 = vld [vmem:[#allocation7 + $0x20] sm:$0xff]   ;;  %v388_v13 = vld [vmem:[#allocation5 + $0x38] sm:$0xff]   ;;  %v395_v14 = vld [vmem:[#allocation7 + $0x28] sm:$0xff]   ;;  %p465_p10 = scmp.ne.s32.totalorder %s284_s21, %s464_s22  ;;  %p470_p12 = scmp.lt.s32.totalorder %s464_s22, %s464_s22 }
  0x3b   :  { %v389_v15 = vld [vmem:[#allocation2] sm:$0xff]   ;;  %v396_v16 = vld [vmem:[#allocation7 + $0x30] sm:$0xff]  }
  0x3c   :  { %v397_v17 = vld [vmem:[#allocation7 + $0x38] sm:$0xff]   ;;  %p471_p13 = por %p470_p12, %p469_p11 }
  0x3d   :  { %334 = vmatpush3.bf16.msra.mxu0 %v382_v2  ;;  %354 = vmatpush3.bf16.msra.mxu1 %v391_v6 }
  0x3e   :  { %335 = vmatprep.subr.bf16.mxu0 %v497_v0  ;;  %355 = vmatprep.subr.bf16.mxu1 %v497_v0  ;;  %p472_p0 = pnand %p471_p13, %p465_p10 }
  0x41   :  { %336 = vmatpush3.bf16.msra.mxu0 %v383_v3  ;;  %356 = vmatpush3.bf16.msra.mxu1 %v392_v8 }
  0x42   :  { %337 = vmatprep.subr.bf16.mxu0 %v497_v0  ;;  %357 = vmatprep.subr.bf16.mxu1 %v497_v0 }
  0x45   :  { %338 = vmatpush3.bf16.msra.mxu0 %v384_v5  ;;  %358 = vmatpush3.bf16.msra.mxu1 %v393_v10 }
  0x46   :  { %339 = vmatprep.subr.bf16.mxu0 %v497_v0  ;;  %359 = vmatprep.subr.bf16.mxu1 %v497_v0 }
  0x49   :  { %340 = vmatpush3.bf16.msra.mxu0 %v385_v7  ;;  %360 = vmatpush3.bf16.msra.mxu1 %v394_v12 }
  0x4a   :  { %341 = vmatprep.subr.bf16.mxu0 %v497_v0  ;;  %361 = vmatprep.subr.bf16.mxu1 %v497_v0 }
  0x4d   :  { %342 = vmatpush3.bf16.msra.mxu0 %v386_v9  ;;  %362 = vmatpush3.bf16.msra.mxu1 %v395_v14 }
  0x4e   :  { %343 = vmatprep.subr.bf16.mxu0 %v497_v0  ;;  %363 = vmatprep.subr.bf16.mxu1 %v497_v0 }
  0x51   :  { %344 = vmatpush3.bf16.msra.mxu0 %v387_v11  ;;  %364 = vmatpush3.bf16.msra.mxu1 %v396_v16 }
  0x52   :  { %345 = vmatprep.subr.bf16.mxu0 %v497_v0  ;;  %365 = vmatprep.subr.bf16.mxu1 %v497_v0 }
  0x55   :  { %346 = vmatpush3.bf16.msra.mxu0 %v388_v13  ;;  %366 = vmatpush3.bf16.msra.mxu1 %v397_v17 }
  0x58   :  { %348 = vmatmul.mubr.bf16.vlgmr.msra.gmra.mrb[0].mxu0 %v389_v15 }
 0x12b   :  { %v163_v18 = vpop.f32.mrb[0].mxu0 }
 0x12c   :  { %v349_v19 = vpop.f32.mrb[1].mxu0 }
 0x12d   :  { %v166_v20 = vpop.f32.mrb[2].mxu0 }
 0x12e   :  { %v170_v21 = vpack.c.bf16 %v166_v20, %v163_v18  ;;  %v350_v22 = vpop.f32.mrb[3].mxu0 }
 0x130   :  { %368 = vmatmul.mubr.bf16.vlgmr.msra.gmra.mrb[0].mxu1 %v170_v21 }
 0x203   :  { %v269_v23 = vpop.f32.mrb[0].mxu1 }
 0x204   :  { %276 = vst [vmem:[#allocation8] sm:$0xff] %v269_v23  ;;  %v369_v24 = vpop.f32.mrb[1].mxu1 }
 0x205   :  { %v272_v25 = vpop.f32.mrb[2].mxu1 }
 0x206   :  { %277 = vst [vmem:[#allocation8 + $0x8] sm:$0xff] %v272_v25  ;;  %v370_v26 = vpop.f32.mrb[3].mxu1 }
 0x207   :  { %475 = shalt.err (!%p472_p0)
}
 0x208   :  { %s476_s25 = scalar_lea.hbm %s589_s3, 256 }
 0x209   :  { %p477_p1 = scmp.ne.s32.totalorder %s589_s3, %s476_s25  ;;  %p480_p2 = scmp.lt.u32.totalorder %s476_s25, %s589_s3 }
 0x20b   :  { %p482_p3 = pnand %p480_p2, %p477_p1 }
 0x20d   :  { %485 = shalt.err (!%p482_p3)
}
 0x20e   :  { %s500_s30 = smov 128   ;;  %s501_s4 = smov 8  }
 0x20f   :  { %289 = dma.vmem_to_hbm [thread:$0]  %s284_s21, 256, %s589_s3, [#allocation4], %s500_s30, %s500_s30, %s501_s4  }
 0x210   :  { %490 = dma.done.wait [#allocation4], 256  }
 0x211   :  { %491 = vsyncadd [#allocation4], 4294967040 }
 0x212   :  { %293 = vsyncpa [#allocation3], 1 }
 0x213   :  { %294 = vsyncpa [#allocation6], 1 }
 0x214   :  { %295 = vsyncpa [#allocation4], 1 }

</bundles_post_ra>
